<compile_context>
chip_gen: v7x
topology: tpu7x:2x2x1
jax: 0.10.0
libtpu: 0.0.40
codegen_flags: <defaults>
</compile_context>

<pallas_src>
import functools

import jax
import jax.numpy as jnp
from jax import lax
from jax.experimental import pallas as pl
from jax.experimental.pallas import tpu as pltpu


def _round_up(x, m):
    return (x + m - 1) // m * m


def _pad_to(a, shape):
    return jnp.pad(a, [(0, s - d) for d, s in zip(a.shape, shape)])


def _vmem_limit(block_bytes):
    # actual double-buffered block footprint + headroom, clamped to sane bounds
    return int(min(max(block_bytes * 3 // 2 + (4 << 20), 32 << 20), 100 << 20))


# ----------------------------------------------------------------------------
# Tiled matmul + bias:  out = x @ w + b   (bf16 MXU inputs, f32 accumulation)
# Used for: per-layer hoisted input projection and the final vocab projection.
# w (and its padding) is expected to be prepared once in init_params (bf16).
# col_major=True makes the row axis innermost so the weight block index is
# constant over the inner loop -> W is DMA'd from HBM exactly once.
# ----------------------------------------------------------------------------
def _matmul_bias_kernel(x_ref, w_ref, b_ref, o_ref):
    acc = jnp.dot(x_ref[...], w_ref[...], preferred_element_type=jnp.float32)
    o_ref[...] = (acc + b_ref[...]).astype(o_ref.dtype)


def matmul_bias_pallas(x, w, b, *, out_dtype=jnp.float32, tile_n=512, tile_m=512,
                       col_major=False):
    N, K = x.shape
    M = w.shape[1]

    # column tile: pick the largest aligned tile that divides M (weights are
    # pre-padded to a multiple of 128 in init_params -> no per-call W copy).
    if M % 128 == 0:
        tm = 128
        for cand in (1024, 512, 256):
            if cand <= tile_m and M % cand == 0:
                tm = cand
                break
        M_pad = M
    else:
        tm = min(_round_up(tile_m, 128), _round_up(M, 128))
        M_pad = _round_up(M, tm)

    tn = min(_round_up(tile_n, 8), _round_up(N, 8))
    N_pad = _round_up(N, tn)

    x_p = x.astype(jnp.bfloat16)                      # no-op when already bf16
    if x_p.shape != (N_pad, K):
        x_p = _pad_to(x_p, (N_pad, K))
    w_p = w if w.shape == (K, M_pad) else _pad_to(w, (K, M_pad))
    b_p = b.astype(jnp.float32).reshape(1, M)
    if M_pad != M:
        b_p = _pad_to(b_p, (1, M_pad))

    if col_major:
        grid = (M_pad // tm, N_pad // tn)             # weight block constant over inner axis
        x_spec = pl.BlockSpec((tn, K), lambda j, i: (i, 0))
        w_spec = pl.BlockSpec((K, tm), lambda j, i: (j, 0))
        b_spec = pl.BlockSpec((1, tm), lambda j, i: (0, j))
        o_spec = pl.BlockSpec((tn, tm), lambda j, i: (i, j))
    else:
        grid = (N_pad // tn, M_pad // tm)
        x_spec = pl.BlockSpec((tn, K), lambda i, j: (i, 0))
        w_spec = pl.BlockSpec((K, tm), lambda i, j: (0, j))
        b_spec = pl.BlockSpec((1, tm), lambda i, j: (0, j))
        o_spec = pl.BlockSpec((tn, tm), lambda i, j: (i, j))

    out_bytes = jnp.dtype(out_dtype).itemsize
    block_bytes = 2 * (tn * K * 2 + K * tm * 2 + tm * 4 + tn * tm * out_bytes)
    cost = pl.CostEstimate(
        flops=2 * N_pad * K * M_pad,
        transcendentals=0,
        bytes_accessed=N_pad * K * 2 + K * M_pad * 2 + M_pad * 4 + N_pad * M_pad * out_bytes)

    out = pl.pallas_call(
        _matmul_bias_kernel,
        out_shape=jax.ShapeDtypeStruct((N_pad, M_pad), out_dtype),
        grid=grid,
        in_specs=[x_spec, w_spec, b_spec],
        out_specs=o_spec,
        compiler_params=pltpu.CompilerParams(
            dimension_semantics=("parallel", "parallel"),
            vmem_limit_bytes=_vmem_limit(block_bytes)),
        cost_estimate=cost,
    )(x_p, w_p, b_p)
    if N_pad != N or M_pad != M:
        out = out[:N, :M]
    return out


# ----------------------------------------------------------------------------
# Recurrent LSTM layer kernel.
# Grid: (batch_shard [parallel], time_chunk index [arbitrary / sequential]).
# Only h_prev @ W_hh is on the critical path (input projection precomputed, bf16).
# h (bf16) and c (f32) are carried through the unrolled fori_loop and written
# back to scratch once per chunk. PyTorch gate order: i, f, g, o; hidden = Hp
# (multiple of 128) so gate slices fall exactly on vreg lane boundaries.
# ----------------------------------------------------------------------------
def _lstm_layer_kernel(gx_ref, whh_ref, out_ref, h_ref, c_ref, *, hidden, time_chunk):
    @pl.when(pl.program_id(1) == 0)          # start of each batch shard's time sweep
    def _():
        h_ref[...] = jnp.zeros_like(h_ref)
        c_ref[...] = jnp.zeros_like(c_ref)

    whh = whh_ref[...]                       # (Hp, 4Hp) bf16, resident across the chunk

    def step(i, carry):
        h_prev, c_prev = carry               # bf16 (Bs,Hp), f32 (Bs,Hp)
        # gates = (x_t @ W_ih + b) [precomputed, bf16] + h_{t-1} @ W_hh [bf16 MXU, f32 acc]
        gates = gx_ref[i].astype(jnp.float32) + jnp.dot(
            h_prev, whh, preferred_element_type=jnp.float32)
        i_g = jax.nn.sigmoid(gates[:, 0 * hidden:1 * hidden])
        f_g = jax.nn.sigmoid(gates[:, 1 * hidden:2 * hidden])
        g_g = jnp.tanh(gates[:, 2 * hidden:3 * hidden])
        o_g = jax.nn.sigmoid(gates[:, 3 * hidden:4 * hidden])
        c_new = f_g * c_prev + i_g * g_g
        h_new = (o_g * jnp.tanh(c_new)).astype(jnp.bfloat16)
        out_ref[i] = h_new                   # single VMEM store per step
        return (h_new, c_new)

    h_fin, c_fin = lax.fori_loop(0, time_chunk, step,
                                 (h_ref[...], c_ref[...]), unroll=True)
    h_ref[...] = h_fin                       # persist state across chunks (once per chunk)
    c_ref[...] = c_fin


def lstm_layer_pallas(gates_x, w_hh, *, hidden_pad, time_chunk, batch_shards):
    """gates_x: (Tp, Bp, 4*Hp) bf16 time-major (bias included); w_hh: (Hp, 4*Hp) bf16."""
    Tp, Bp, G = gates_x.shape
    Bs = Bp // batch_shards

    block_bytes = (2 * time_chunk * Bs * G * 2          # gx (double-buffered, bf16)
                   + 2 * hidden_pad * G * 2             # W_hh
                   + 2 * time_chunk * Bs * hidden_pad * 2   # out
                   + Bs * hidden_pad * (2 + 4))         # h (bf16) + c (f32) scratch
    cost = pl.CostEstimate(
        flops=2 * Tp * Bp * hidden_pad * G + 10 * Tp * Bp * hidden_pad,
        transcendentals=5 * Tp * Bp * hidden_pad,
        bytes_accessed=Tp * Bp * G * 2 + hidden_pad * G * 2 + Tp * Bp * hidden_pad * 2)

    return pl.pallas_call(
        functools.partial(_lstm_layer_kernel, hidden=hidden_pad, time_chunk=time_chunk),
        out_shape=jax.ShapeDtypeStruct((Tp, Bp, hidden_pad), jnp.bfloat16),
        grid=(batch_shards, Tp // time_chunk),
        in_specs=[
            pl.BlockSpec((time_chunk, Bs, G), lambda b, t: (t, b, 0)),
            pl.BlockSpec((hidden_pad, G), lambda b, t: (0, 0)),   # constant weight block
        ],
        out_specs=pl.BlockSpec((time_chunk, Bs, hidden_pad), lambda b, t: (t, b, 0)),
        scratch_shapes=[
            pltpu.VMEM((Bs, hidden_pad), jnp.bfloat16),           # h state
            pltpu.VMEM((Bs, hidden_pad), jnp.float32),            # c state
        ],
        compiler_params=pltpu.CompilerParams(
            dimension_semantics=("parallel", "arbitrary"),        # batch shards // time serial
            vmem_limit_bytes=_vmem_limit(block_bytes)),
        cost_estimate=cost,
    )(gates_x, w_hh)


# ----------------------------------------------------------------------------
# DecoderRNN forward
# ----------------------------------------------------------------------------
def decoder_forward(params, features, captions, lengths):
    """features: (B, E) f32, captions: (B, T) int32, lengths: python list sorted descending."""
    B, T = captions.shape
    Ep = params["embed_pad"]
    Hp = params["hidden_pad"]
    TC = params["time_chunk"]
    V = params["vocab_size"]

    lengths = [int(l) for l in lengths]
    assert lengths == sorted(lengths, reverse=True), "lengths must be sorted descending"
    assert max(lengths) <= T + 1

    # ---- embedding lookup + feature concat (JAX glue) ----
    emb = params["embed"][captions]                                # (B, T, E)
    seq = jnp.concatenate([features[:, None, :], emb], axis=1)     # (B, T+1, E)
    seq = jnp.transpose(seq, (1, 0, 2))                            # (T+1, B, E) time-major

    # pad: time -> chunk multiple, batch -> sublane (8), embed -> lane (128)
    T1 = T + 1
    Tp, Bp = _round_up(T1, TC), _round_up(B, 8)
    bshards = 2 if Bp % 16 == 0 else 1       # 2 TCs on v7x; single shard on 1-TC chips / tiny B
    x = _pad_to(seq, (Tp, Bp, Ep)).astype(jnp.bfloat16)            # (Tp, Bp, Ep)

    # row tile for the hoisted projection: divides Tp*Bp exactly -> no pad-slice copy
    tn_in = TC * Bp
    while tn_in > 4096 and tn_in % 16 == 0:
        tn_in //= 2

    # ---- stacked LSTM: per layer, hoisted input GEMM then recurrent kernel ----
    for (w_ih, w_hh, b) in params["lstm"]:
        K = x.shape[-1]
        gx = matmul_bias_pallas(x.reshape(Tp * Bp, K), w_ih, b,
                                out_dtype=jnp.bfloat16, tile_n=tn_in)   # (Tp*Bp, 4Hp) bf16
        x = lstm_layer_pallas(gx.reshape(Tp, Bp, 4 * Hp), w_hh,
                              hidden_pad=Hp, time_chunk=TC,
                              batch_shards=bshards)                # (Tp, Bp, Hp) bf16

    # ---- pack_padded_sequence ordering: lengths sorted desc -> valid rows at
    # time t are the batch prefix of size n_t; contiguous slices, no gather. ----
    max_len = max(lengths)
    slices = []
    for t in range(max_len):
        n_t = sum(1 for l in lengths if l > t)
        slices.append(x[t, :n_t, :])
    h_packed = jnp.concatenate(slices, axis=0)                     # (sum(len), Hp) bf16

    # ---- vocab projection: col-major tiled GEMM -> Hp x V weight streamed once ----
    logits = matmul_bias_pallas(h_packed, params["linear_w"], params["linear_b"],
                                out_dtype=jnp.float32, tile_n=2048, col_major=True)
    if logits.shape[1] != V:
        logits = logits[:, :V]
    return logits


# ----------------------------------------------------------------------------
# Deterministic parameter init.  Weights are stored transposed for x @ W,
# pre-padded AND pre-cast to bf16 once: each of the four gate blocks (i,f,g,o)
# is zero-padded H -> Hp independently, input/hidden dims zero-padded, and
# b = b_ih + b_hh is pre-summed so padded hidden units stay exactly zero
# through the recurrence.
# ----------------------------------------------------------------------------
def init_params(key, embed_size, hidden_size, vocab_size, num_layers, time_chunk=8):
    Hp = _round_up(hidden_size, 128)
    Ep = _round_up(embed_size, 128)
    Vp = _round_up(vocab_size, 128)
    ks = jax.random.split(key, 3 + 4 * num_layers)
    scale = 0.1
    params = {
        "hidden_size": hidden_size,
        "hidden_pad": Hp,
        "embed_pad": Ep,
        "vocab_size": vocab_size,
        "time_chunk": time_chunk,
        "embed": scale * jax.random.normal(ks[0], (vocab_size, embed_size), jnp.float32),
        # rows >= hidden_size / cols >= vocab_size are zero; pre-cast to bf16 once
        "linear_w": _pad_to(
            scale * jax.random.normal(ks[1], (hidden_size, vocab_size), jnp.float32),
            (Hp, Vp)).astype(jnp.bfloat16),
        "linear_b": _pad_to(
            scale * jax.random.normal(ks[2], (vocab_size,), jnp.float32), (Vp,)),
        "lstm": [],
    }

    def pad_gates(w, rows_pad):
        w4 = w.reshape(w.shape[0], 4, hidden_size)
        w4 = jnp.pad(w4, ((0, rows_pad - w.shape[0]), (0, 0), (0, Hp - hidden_size)))
        return w4.reshape(rows_pad, 4 * Hp)

    for l in range(num_layers):
        in_dim = embed_size if l == 0 else hidden_size
        in_pad = Ep if l == 0 else Hp
        k0, k1, k2, k3 = ks[3 + 4 * l: 7 + 4 * l]
        w_ih = scale * jax.random.normal(k0, (in_dim, 4 * hidden_size), jnp.float32)
        w_hh = scale * jax.random.normal(k1, (hidden_size, 4 * hidden_size), jnp.float32)
        b_ih = scale * jax.random.normal(k2, (4 * hidden_size,), jnp.float32)
        b_hh = scale * jax.random.normal(k3, (4 * hidden_size,), jnp.float32)

        b = (b_ih + b_hh).reshape(4, hidden_size)
        b = jnp.pad(b, ((0, 0), (0, Hp - hidden_size))).reshape(4 * Hp)

        params["lstm"].append((
            pad_gates(w_ih, in_pad).astype(jnp.bfloat16),   # (in_pad, 4Hp) bf16, pre-padded
            pad_gates(w_hh, Hp).astype(jnp.bfloat16),       # (Hp, 4Hp)    bf16, pre-padded
            b,                                              # (4Hp,) f32 (pre-summed b_ih + b_hh)
        ))
    return params


if __name__ == "__main__":
    embed_size, hidden_size, vocab_size, num_layers = 32, 32, 64, 2
    B, T = 2, 8
    lengths = [9, 6]  # sorted descending; max length = T + 1 (image feature is step 0)

    key = jax.random.PRNGKey(0)
    k_p, k_f, k_c = jax.random.split(key, 3)

    params = init_params(k_p, embed_size, hidden_size, vocab_size, num_layers)
    features = jax.random.normal(k_f, (B, embed_size), jnp.float32)
    captions = jax.random.randint(k_c, (B, T), 0, vocab_size, jnp.int32)

    out = decoder_forward(params, features, captions, lengths)
    jax.block_until_ready(out)
    assert out.shape == (sum(lengths), vocab_size), out.shape
    assert bool(jnp.all(jnp.isfinite(out)))
    print("KERNEL_OK")
</pallas_src>

<mosaic_0001>
module attributes {stable_mosaic.version = 11 : i64} {
  func.func @_matmul_bias_kernel(%arg0: i32, %arg1: i32, %arg2: memref<64x128xbf16, #tpu.memory_space<vmem>>, %arg3: memref<128x512xbf16, #tpu.memory_space<vmem>>, %arg4: memref<1x512xf32, #tpu.memory_space<vmem>>, %arg5: memref<64x512xbf16, #tpu.memory_space<vmem>>) attributes {dimension_semantics = [#tpu.dimension_semantics<parallel>, #tpu.dimension_semantics<parallel>], iteration_bounds = array<i64: 2, 1>, scalar_prefetch = 0 : i64, scratch_operands = 0 : i64, tpu.core_type = #tpu.core_type<tc>, window_params = [{transform_indices = @transform_0, window_bounds = array<i64: 64, 128>}, {transform_indices = @transform_1, window_bounds = array<i64: 128, 512>}, {transform_indices = @transform_2, window_bounds = array<i64: 1, 512>}, {transform_indices = @transform_3, window_bounds = array<i64: 64, 512>}]} {
    %c0 = arith.constant 0 : index
    %c0_0 = arith.constant 0 : index
    %0 = vector.load %arg2[%c0, %c0_0] : memref<64x128xbf16, #tpu.memory_space<vmem>>, vector<64x128xbf16>
    %c0_1 = arith.constant 0 : index
    %c0_2 = arith.constant 0 : index
    %1 = vector.load %arg3[%c0_1, %c0_2] : memref<128x512xbf16, #tpu.memory_space<vmem>>, vector<128x512xbf16>
    %cst = arith.constant dense<0.000000e+00> : vector<64x512xf32>
    %2 = tpu.matmul %0, %1, %cst {dimension_numbers = #tpu.dot_dimension_numbers<[1], [0], [0], [1], [0, 0, 1, 1], [], []>} : vector<64x128xbf16>, vector<128x512xbf16>, vector<64x512xf32> -> vector<64x512xf32>
    %c0_3 = arith.constant 0 : index
    %c0_4 = arith.constant 0 : index
    %3 = vector.load %arg4[%c0_3, %c0_4] : memref<1x512xf32, #tpu.memory_space<vmem>>, vector<1x512xf32>
    %4 = vector.broadcast %3 : vector<1x512xf32> to vector<64x512xf32>
    %5 = arith.addf %2, %4 : vector<64x512xf32>
    %6 = arith.truncf %5 : vector<64x512xf32> to vector<64x512xbf16>
    %c0_5 = arith.constant 0 : index
    %c0_6 = arith.constant 0 : index
    %7 = vector.load %arg5[%c0_5, %c0_6] : memref<64x512xbf16, #tpu.memory_space<vmem>>, vector<64x512xbf16>
    tpu.vector_store %arg5[%c0_5, %c0_6], %6 {strides = array<i32>} : memref<64x512xbf16, #tpu.memory_space<vmem>>, vector<64x512xbf16>,
    return
  }
  func.func @transform_0(%arg0: i32, %arg1: i32) -> (i32, i32) {
    %c0_i32 = arith.constant 0 : i32
    %c0_i32_0 = arith.constant 0 : i32
    return %arg0, %c0_i32 : i32, i32
  }
  func.func @transform_1(%arg0: i32, %arg1: i32) -> (i32, i32) {
    %c0_i32 = arith.constant 0 : i32
    %c0_i32_0 = arith.constant 0 : i32
    return %c0_i32, %arg1 : i32, i32
  }
  func.func @transform_2(%arg0: i32, %arg1: i32) -> (i32, i32) {
    %c0_i32 = arith.constant 0 : i32
    %c0_i32_0 = arith.constant 0 : i32
    return %c0_i32, %arg1 : i32, i32
  }
  func.func @transform_3(%arg0: i32, %arg1: i32) -> (i32, i32) {
    %c0_i32 = arith.constant 0 : i32
    return %arg0, %arg1 : i32, i32
  }
}

</mosaic_0001>

<bundles_post_ra>
// kernel: tpu_custom_call.1
= control target key start
LH: loop header
LB: loop body
LE: loop exit
PB: predicated region body
PF: predicated region fallthrough
CT: control target
= control target key end

     0   :  { %8 = vsyncpa [#allocation3], 0  ;;  %s1573_s0 = inlined_call_operand.hbm [shape: bf16[128,128], index: 0, kind: input, shape index: {}]   ;;  %s1574_s1 = inlined_call_operand.hbm [shape: bf16[128,512], index: 1, kind: input, shape index: {}]   ;;  %s1575_s2 = inlined_call_operand.vmem [shape: f32[1,512], index: 2, kind: input, shape index: {}]   ;;  %s1576_s3 = inlined_call_operand.hbm [shape: bf16[128,512], index: 3, kind: output, shape index: {}]  }
   0x1   :  { %10 = vsyncpa [#allocation3 + $0x1], 0 }
   0x2   :  { %11 = vsyncpa [#allocation6], 0 }
   0x3   :  { %12 = vsyncpa [#allocation4], 0 }
   0x4   :  { %14 = vsyncpa [#allocation4 + $0x1], 0  ;;  %s1277_s12 = smov 0   ;;  %s1279_s13 = smov 0  }
   0x5   :  { %s1281_s14 = smov 0   ;;  %s1283_s15 = smov 0  }
   0x6   :  { %s1285_s16 = smov 0   ;;  %s1287_s17 = smov 0  }
   0x7 LB: > { %s879_s18 = sadd.s32 4294967295, %s1245_s17   ;;  %s880_s19 = sadd.s32 4294967294, %s1245_s17   ;;  %s1245_s17 = sphi %s1287_s17, %s20_s17   ;;  %s1241_s16 = sphi %s1285_s16, %s1600_s16   ;;  %s1237_s15 = sphi %s1283_s15, %s1599_s15   ;;  %s1233_s14 = sphi %s1281_s14, %s1598_s14   ;;  %s1229_s13 = sphi %s1279_s13, %s1597_s13   ;;  %s1225_s12 = sphi %s1277_s12, %s1596_s12  }
   0x8   : > { %p52_p0 = scmp.ne.s32.totalorder %s1229_s13, %s1225_s12  ;;  %p1311_p1 = scmp.eq.s32.totalorder %s879_s18, 0 }
   0x9   : > { %p1315_p2 = scmp.eq.s32.totalorder %s879_s18, 1  ;;  %p136_p3 = scmp.eq.s32.totalorder %s880_s19, 1 }
   0xa   : > { %s1581_s20 = scalar_select %p1311_p1, 1, 0 }
   0xb   : > { %s1582_s21 = scalar_select %p1315_p2, 1, 0 }
   0xc   : > { %p1321_p4 = por %p1311_p1, %p52_p0  ;;  %p881_p5 = scmp.ge.s32.totalorder %s1245_s17, 1 }
   0xd   : > { %p1326_p6 = por %p136_p3, %p52_p0  ;;  %p143_p7 = scmp.lt.s32.totalorder %s1245_s17, 3 }
   0xe   : > { %s1583_s22 = scalar_select %p1321_p4, 1, 0 }
   0xf   : > { %s1584_s23 = scalar_select %p1326_p6, 1, 0 }
  0x10   : > { %p1331_p8 = pnand %p881_p5, %p143_p7  ;;  %s1247_s25 = smov [#allocation5]  }
  0x11   : > { %s158_s26 = sshll.u32 %s1247_s25, 4  ;;  %s32_s28 = sadd.s32 1, %s1241_s16  ;;  %s159_s26 = int_to_ptr.vmem [resolvable:$true] %s158_s26 }
  0x12   : > { %s1585_s24 = scalar_select %p1331_p8, 1, 0 }
  0x13   : > { %p977_p9 = pneg %p1331_p8  ;;  %s1101_s4 = scalar_lea.hbm %s1574_s1, 4096 }
  0x14   : > { %p1102_p12 = scmp.ne.s32.totalorder %s1574_s1, %s1101_s4  ;;  %p1108_p5 = scmp.lt.u32.totalorder %s1101_s4, %s1574_s1 }
  0x15   : > { %p1340_p11 = pnand %p977_p9, %p1311_p1 }
  0x17   : > { %p1103_p13 = pneg %p1340_p11 }
  0x19   : > { %p1104_p0 = pnand %p1103_p13, %p1102_p12 }
  0x1b   : > { %p1105_p3 = pneg %p1104_p0 }
  0x1d   : > { %p1110_p7 = pnand %p1108_p5, %p1105_p3 }
  0x1f   : > { %1113 = shalt.err (!%p1110_p7)
}
  0x20   : > { %s1114_s9 = scalar_lea.vmem %s159_s26, 4096  ;;  %p1122_p1 = scmp.lt.s32.totalorder %s159_s26, %s159_s26 }
  0x21   : > { %p1115_p9 = scmp.ne.s32.totalorder %s159_s26, %s1114_s9  ;;  %p1123_p4 = scmp.lt.s32.totalorder %s1114_s9, %s1114_s9 }
  0x23   : > { %p1117_p10 = pnand %p1115_p9, %p1103_p13  ;;  %p1124_p8 = por %p1123_p4, %p1122_p1 }
  0x25   : > { %p1118_p6 = pneg %p1117_p10 }
  0x27   : > { %p1125_p2 = pnand %p1124_p8, %p1118_p6 }
  0x29   : > { %1128 = shalt.err (!%p1125_p2)
}
  0x2a   : > { %s1248_s10 = smov 256   ;;  %s1249_s11 = smov 16  }
  0x2b   : > { %980 = dma.hbm_to_vmem [thread:$0]  (!%p1340_p11), %s1574_s1, 4096, %s159_s26, [#allocation6], %s1248_s10, %s1248_s10, %s1249_s11  }
  0x2c   : > { %p34_p1 = scmp.ge.s32.totalorder %s32_s28, 2  ;;  %s39_s25 = sadd.s32 1, %s1233_s14 }
  0x2d   : > { %p46_p2 = scmp.ne.s32.totalorder %s1233_s14, %s1229_s13  ;;  %p47_p4 = scmp.eq.s32.totalorder %s1245_s17, 0 }
  0x2e   : > { %s1602_s28 = smov (%p34_p1, %s32_s28), 0  ;;  %p1588_p8 = scmp.ne.s32.totalorder %s1582_s21, 0 }
  0x2f   : > { %p1367_p6 = por %p47_p4, %p46_p2  ;;  %s36_s27 = ssub.s32 %s1241_s16, %s1602_s28 }
  0x30   : > { %p1373_p10 = por %p1588_p8, %p46_p2  ;;  %p990_p12 = scmp.lt.s32.totalorder %s1245_s17, 2 }
  0x31   : > { %p37_p11 = scmp.eq.s32.totalorder %s36_s27, 0  ;;  %s180_s26 = sand.u32 1, %s1233_s14  }
  0x32   : > { %s885_s4 = sshll.u32 %s180_s26, 5  ;;  %s950_s6 = sshll.u32 %s1241_s16, 9 }
  0x33   : > { %s1382_s5 = scalar_select %p37_p11, %s1233_s14, %s39_s25  }
  0x34   : > { %s1388_s9 = scalar_lea.hbm %s1573_s0, %s950_s6  ;;  %s184_s21 = scalar_lea.vmem [#allocation2], %s885_s4 }
  0x35   : > { %s191_s10 = sshll.u32 %s184_s21, 4  ;;  %p1394_p13 = pnand %p990_p12, %p1367_p6  ;;  %s1390_s10 = int_to_ptr.vmem [resolvable:$true] %s191_s10 }
  0x36   : > { %s1398_s18 = scalar_lea.sflag [#allocation3], %s180_s26  ;;  %s1129_s19 = scalar_lea.hbm %s1388_s9, 512 }
  0x37   : > { %p1130_p0 = scmp.ne.s32.totalorder %s1388_s9, %s1129_s19  ;;  %p1131_p3 = pneg %p1394_p13 }
  0x38   : > { %s1134_s29 = scalar_lea.hbm %s1573_s0, 1024  ;;  %p1135_p9 = scmp.lt.u32.totalorder %s1388_s9, %s1573_s0 }
  0x39   : > { %p1132_p5 = pnand %p1131_p3, %p1130_p0  ;;  %p1136_p1 = scmp.lt.u32.totalorder %s1134_s29, %s1129_s19 }
  0x3a   : > { %p1138_p4 = scmp.lt.u32.totalorder %s1129_s19, %s1388_s9 }
  0x3b   : > { %p1133_p7 = pneg %p1132_p5  ;;  %p1137_p2 = por %p1136_p1, %p1135_p9 }
  0x3d   : > { %p1139_p6 = por %p1138_p4, %p1137_p2 }
  0x3f   : > { %p1140_p8 = pnand %p1139_p6, %p1133_p7 }
  0x41   : > { %1143 = shalt.err (!%p1140_p8)
}
  0x42   : > { %s1144_s26 = scalar_lea.vmem %s1390_s10, 512  ;;  %s1250_s7 = smov [#allocation2]  }
  0x43   : > { %p1145_p12 = scmp.ne.s32.totalorder %s1390_s10, %s1144_s26  ;;  %s1149_s8 = sshll.u32 %s1250_s7, 4  ;;  %s1150_s8 = int_to_ptr.vmem [resolvable:$false] %s1149_s8 }
  0x44   : > { %s1151_s21 = scalar_lea.vmem %s1150_s8, 1024  ;;  %p1152_p5 = scmp.lt.s32.totalorder %s1390_s10, %s1150_s8 }
  0x45   : > { %p1147_p11 = pnand %p1145_p12, %p1131_p3  ;;  %p1153_p9 = scmp.lt.s32.totalorder %s1151_s21, %s1144_s26 }
  0x47   : > { %p1148_p0 = pneg %p1147_p11  ;;  %p1154_p1 = por %p1153_p9, %p1152_p5 }
  0x49   : > { %p1155_p2 = pnand %p1154_p1, %p1148_p0 }
  0x4b   : > { %1158 = shalt.err (!%p1155_p2)
}
  0x4c   : > { %s1251_s19 = smov 64   ;;  %s1252_s25 = smov 4  }
  0x4d   : > { %984 = dma.hbm_to_vmem [thread:$0]  (!%p1394_p13), %s1388_s9, 512, %s1390_s10, %s1398_s18, %s1251_s19, %s1251_s19, %s1252_s25  }
  0x4e   : > { %p1591_p3 = scmp.ne.s32.totalorder %s1585_s24, 0 }
  0x4f   : > { %s1429_s27 = sand.u32 (!%p1591_p3), 1, %s1229_s13   ;;  %p1592_p7 = scmp.ne.s32.totalorder (!%p1591_p3), %s1583_s22, 0 }
  0x50   : > { %203 = sbr.rel (%p1591_p3) target bundleno = 383 (0x17f), region = 32  ;;  %s889_s29 = sshll.u32 (!%p1591_p3), %s1429_s27, 5 }
  0x51   : > { %s206_s4 = scalar_lea.sflag (!%p1591_p3), [#allocation3], %s1429_s27  ;;  %s1433_s6 = scalar_lea.vmem (!%p1591_p3), [#allocation2], %s889_s29 }
  0x57   : > { %1212 = dma.done.wait (%p1592_p7), %s206_s4, 512  }
  0x58   : > { %1214 = vsyncadd (%p1592_p7), %s206_s4, 4294966784  ;;  %p1593_p13 = scmp.ne.s32.totalorder %s1581_s20, 0 }
  0x5a   : > { %1216 = dma.done.wait (%p1593_p13), [#allocation6], 4096  }
  0x5b   : > { %1218 = vsyncadd (%p1593_p13), [#allocation6], 4294963200  ;;  %v1253_v0 = vmov 0   ;;  %v1049_v1 = vld [vmem:[#allocation5 + $0x4] ss:$16 sps:$4 sm:$0xff]   ;;  %v1098_v34 = vld [vmem:[%s1433_s6 + $0x8] sm:$0xff]   ;;  %v292_v37 = vlaneseq }
  0x5c   : > { %528 = vmatprep.mubr.bf16.mxu0 %v1253_v0  ;;  %601 = vmatprep.mubr.bf16.mxu1 %v1253_v0  ;;  %v1051_v2 = vld [vmem:[#allocation5 + $0xc] ss:$16 sps:$4 sm:$0xff]   ;;  %v1053_v3 = vld [vmem:[#allocation5] ss:$16 sps:$4 sm:$0xff]   ;;  %v1054_v4 = vld [vmem:[#allocation5 + $0x8] ss:$16 sps:$4 sm:$0xff]  }
  0x5d   : > { %496 = vmatprep.subr.bf16.mxu0 %v1049_v1  ;;  %569 = vmatprep.subr.bf16.mxu1 %v1051_v2  ;;  %v1055_v5 = vld [vmem:[#allocation5 + $0x24] ss:$16 sps:$4 sm:$0xff]   ;;  %v1057_v6 = vld [vmem:[#allocation5 + $0x2c] ss:$16 sps:$4 sm:$0xff]   ;;  %v1059_v7 = vld [vmem:[#allocation5 + $0x20] ss:$16 sps:$4 sm:$0xff]  }
  0x5e   : > { %497 = vmatpush1.bf16.msra.mxu0 %v1053_v3  ;;  %570 = vmatpush1.bf16.msra.mxu1 %v1054_v4  ;;  %v1060_v8 = vld [vmem:[#allocation5 + $0x28] ss:$16 sps:$4 sm:$0xff]   ;;  %v1061_v9 = vld [vmem:[#allocation5 + $0x44] ss:$16 sps:$4 sm:$0xff]   ;;  %v1063_v10 = vld [vmem:[#allocation5 + $0x4c] ss:$16 sps:$4 sm:$0xff]  }
  0x5f   : > { %498 = vmatprep.subr.bf16.mxu0 %v1055_v5  ;;  %571 = vmatprep.subr.bf16.mxu1 %v1057_v6  ;;  %v1065_v11 = vld [vmem:[#allocation5 + $0x40] ss:$16 sps:$4 sm:$0xff]   ;;  %v1066_v12 = vld [vmem:[#allocation5 + $0x48] ss:$16 sps:$4 sm:$0xff]   ;;  %v1067_v13 = vld [vmem:[#allocation5 + $0x64] ss:$16 sps:$4 sm:$0xff]  }
  0x60   : > { %v1069_v14 = vld [vmem:[#allocation5 + $0x6c] ss:$16 sps:$4 sm:$0xff]   ;;  %v1071_v15 = vld [vmem:[#allocation5 + $0x60] ss:$16 sps:$4 sm:$0xff]   ;;  %v1072_v16 = vld [vmem:[#allocation5 + $0x68] ss:$16 sps:$4 sm:$0xff]  }
  0x61   : > { %v1073_v17 = vld [vmem:[#allocation5 + $0x84] ss:$16 sps:$4 sm:$0xff]   ;;  %v1075_v18 = vld [vmem:[#allocation5 + $0x8c] ss:$16 sps:$4 sm:$0xff]   ;;  %v1077_v19 = vld [vmem:[#allocation5 + $0x80] ss:$16 sps:$4 sm:$0xff]  }
  0x62   : > { %499 = vmatpush1.bf16.msra.mxu0 %v1059_v7  ;;  %572 = vmatpush1.bf16.msra.mxu1 %v1060_v8  ;;  %v1078_v20 = vld [vmem:[#allocation5 + $0x88] ss:$16 sps:$4 sm:$0xff]   ;;  %v1079_v21 = vld [vmem:[#allocation5 + $0xa4] ss:$16 sps:$4 sm:$0xff]   ;;  %v1081_v22 = vld [vmem:[#allocation5 + $0xac] ss:$16 sps:$4 sm:$0xff]  }
  0x63   : > { %500 = vmatprep.subr.bf16.mxu0 %v1061_v9  ;;  %573 = vmatprep.subr.bf16.mxu1 %v1063_v10  ;;  %v1083_v23 = vld [vmem:[#allocation5 + $0xa0] ss:$16 sps:$4 sm:$0xff]   ;;  %v1084_v24 = vld [vmem:[#allocation5 + $0xa8] ss:$16 sps:$4 sm:$0xff]   ;;  %v1085_v25 = vld [vmem:[#allocation5 + $0xc4] ss:$16 sps:$4 sm:$0xff]  }
  0x64   : > { %v1087_v26 = vld [vmem:[#allocation5 + $0xcc] ss:$16 sps:$4 sm:$0xff]   ;;  %v1089_v27 = vld [vmem:[#allocation5 + $0xc0] ss:$16 sps:$4 sm:$0xff]   ;;  %v1090_v28 = vld [vmem:[#allocation5 + $0xc8] ss:$16 sps:$4 sm:$0xff]  }
  0x65   : > { %v1091_v29 = vld [vmem:[#allocation5 + $0xe4] ss:$16 sps:$4 sm:$0xff]   ;;  %v1093_v30 = vld [vmem:[#allocation5 + $0xec] ss:$16 sps:$4 sm:$0xff]   ;;  %v1095_v31 = vld [vmem:[#allocation5 + $0xe0] ss:$16 sps:$4 sm:$0xff]  }
  0x66   : > { %501 = vmatpush1.bf16.msra.mxu0 %v1065_v11  ;;  %574 = vmatpush1.bf16.msra.mxu1 %v1066_v12  ;;  %v1096_v32 = vld [vmem:[#allocation5 + $0xe8] ss:$16 sps:$4 sm:$0xff]   ;;  %v1097_v33 = vld [vmem:[%s1433_s6] sm:$0xff]   ;;  %v1099_v35 = vld [vmem:[%s1433_s6 + $0x10] sm:$0xff]   ;;  %v293_v38 = vshrl.u32 %v292_v37, 7  ;;  %s891_s24 = sshll.u32 %s1429_s27, 7 }
  0x67   : > { %502 = vmatprep.subr.bf16.mxu0 %v1067_v13  ;;  %575 = vmatprep.subr.bf16.mxu1 %v1069_v14  ;;  %v1100_v36 = vld [vmem:[%s1433_s6 + $0x18] sm:$0xff]   ;;  %v290_v41 = vld [vmem:[%s1575_s2] sm:$0xf]  ;;  %s1475_s9 = scalar_lea.vmem [#allocation7], %s891_s24  ;;  %s968_s10 = sshll.u32 %s1237_s15, 11 }
  0x68   : > { %v294_v39 = vsub.s32 0, %v293_v38  ;;  %v302_v40 = vsub.s32 2, %v293_v38  ;;  %v298_v42 = vsub.s32 1, %v293_v38  ;;  %v306_v43 = vsub.s32 3, %v293_v38  ;;  %s771_s11 = sshll.u32 %s1475_s9, 4  ;;  %s1518_s15 = scalar_lea.hbm %s1576_s3, %s968_s10  ;;  %s1520_s11 = int_to_ptr.vmem [resolvable:$true] %s771_s11 }
  0x69   : > { %s755_s7 = scalar_lea.sflag [#allocation4], %s1429_s27  ;;  %s1159_s8 = scalar_lea.vmem %s1520_s11, 2048 }
  0x6a   : > { %503 = vmatpush1.bf16.msra.mxu0 %v1071_v15  ;;  %576 = vmatpush1.bf16.msra.mxu1 %v1072_v16  ;;  %v1458_v44 = vrot.slane %v290_v41, %v294_v39  ;;  %v1460_v45 = vrot.slane %v290_v41, %v302_v40  ;;  %v1462_v46 = vrot.slane %v290_v41, %v298_v42  ;;  %p1160_p4 = scmp.ne.s32.totalorder %s1520_s11, %s1159_s8  ;;  %s1254_s21 = smov [#allocation7]  }
  0x6b   : > { %504 = vmatprep.subr.bf16.mxu0 %v1073_v17  ;;  %577 = vmatprep.subr.bf16.mxu1 %v1075_v18  ;;  %v1464_v47 = vrot.slane %v290_v41, %v306_v43  ;;  %s1163_s19 = sshll.u32 %s1254_s21, 4  ;;  %s1164_s19 = int_to_ptr.vmem [resolvable:$false] %s1163_s19 }
  0x6c   : > { %p1161_p6 = pnand %p1160_p4, %p1373_p10  ;;  %s1165_s25 = scalar_lea.vmem %s1164_s19, 4096 }
  0x6d   : > { %p1166_p12 = scmp.lt.s32.totalorder %s1520_s11, %s1164_s19  ;;  %p1167_p11 = scmp.lt.s32.totalorder %s1165_s25, %s1159_s8 }
  0x6e   : > { %505 = vmatpush1.bf16.msra.mxu0 %v1077_v19  ;;  %578 = vmatpush1.bf16.msra.mxu1 %v1078_v20  ;;  %p1162_p8 = pneg %p1161_p6 }
  0x6f   : > { %506 = vmatprep.subr.bf16.mxu0 %v1079_v21  ;;  %579 = vmatprep.subr.bf16.mxu1 %v1081_v22  ;;  %p1168_p0 = por %p1167_p11, %p1166_p12 }
  0x71   : > { %p1169_p5 = pnand %p1168_p0, %p1162_p8 }
  0x72   : > { %507 = vmatpush1.bf16.msra.mxu0 %v1083_v23  ;;  %580 = vmatpush1.bf16.msra.mxu1 %v1084_v24 }
  0x73   : > { %508 = vmatprep.subr.bf16.mxu0 %v1085_v25  ;;  %581 = vmatprep.subr.bf16.mxu1 %v1087_v26 }
  0x76   : > { %509 = vmatpush1.bf16.msra.mxu0 %v1089_v27  ;;  %582 = vmatpush1.bf16.msra.mxu1 %v1090_v28 }
  0x77   : > { %510 = vmatprep.subr.bf16.mxu0 %v1091_v29  ;;  %583 = vmatprep.subr.bf16.mxu1 %v1093_v30 }
  0x7a   : > { %511 = vmatpush1.bf16.msra.mxu0 %v1095_v31  ;;  %584 = vmatpush1.bf16.msra.mxu1 %v1096_v32 }
  0x7d   : > { %529 = vmatmul.mubr.bf16.vlgmr.msra.gmra.mrb[0].mxu0 %v1097_v33  ;;  %602 = vmatmul.mubr.bf16.vlgmr.msra.gmra.mrb[0].mxu1 %v1097_v33 }
  0x7e   : > { %538 = vmatprep.mubr.bf16.mxu0 %v1253_v0  ;;  %611 = vmatprep.mubr.bf16.mxu1 %v1253_v0 }
  0x85   : > { %539 = vmatmul.mubr.bf16.gmra.mrb[4].mxu0 %v1098_v34  ;;  %612 = vmatmul.mubr.bf16.gmra.mrb[4].mxu1 %v1098_v34 }
  0x86   : > { %548 = vmatprep.mubr.bf16.mxu0 %v1253_v0  ;;  %621 = vmatprep.mubr.bf16.mxu1 %v1253_v0 }
  0x8d   : > { %549 = vmatmul.mubr.bf16.gmra.mrb[8].mxu0 %v1099_v35  ;;  %622 = vmatmul.mubr.bf16.gmra.mrb[8].mxu1 %v1099_v35 }
  0x8e   : > { %558 = vmatprep.mubr.bf16.mxu0 %v1253_v0  ;;  %631 = vmatprep.mubr.bf16.mxu1 %v1253_v0 }
  0x95   : > { %559 = vmatmul.mubr.bf16.gmra.mrb[12].mxu0 %v1100_v36  ;;  %632 = vmatmul.mubr.bf16.gmra.mrb[12].mxu1 %v1100_v36 }
 0x150   : > { %v530_v48 = vpop.f32.mrb[0].mxu0  ;;  %v603_v49 = vpop.f32.mrb[0].mxu1 }
 0x151   : > { %v531_v50 = vadd.f32 %v530_v48, %v1458_v44  ;;  %v604_v51 = vadd.f32 %v603_v49, %v1460_v45  ;;  %v532_v52 = vpop.f32.mrb[1].mxu0  ;;  %v605_v53 = vpop.f32.mrb[1].mxu1 }
 0x152   : > { %v533_v54 = vadd.f32 %v532_v52, %v1462_v46  ;;  %v606_v55 = vadd.f32 %v605_v53, %v1464_v47  ;;  %v534_v56 = vpop.f32.mrb[2].mxu0  ;;  %v607_v57 = vpop.f32.mrb[2].mxu1 }
 0x153   : > { %v535_v58 = vadd.f32 %v534_v56, %v1458_v44  ;;  %v608_v59 = vadd.f32 %v607_v57, %v1460_v45  ;;  %v536_v60 = vpop.f32.mrb[3].mxu0  ;;  %v609_v61 = vpop.f32.mrb[3].mxu1 }
 0x154   : > { %v951_v62 = vpack.c.bf16 %v533_v54, %v531_v50  ;;  %v952_v63 = vpack.c.bf16 %v606_v55, %v604_v51  ;;  %v537_v0 = vadd.f32 %v536_v60, %v1462_v46  ;;  %v610_v1 = vadd.f32 %v609_v61, %v1464_v47 }
 0x156   : > { %738 = vst [vmem:[%s1475_s9] sm:$0xff] %v951_v62  ;;  %739 = vst [vmem:[%s1475_s9 + $0x8] sm:$0xff] %v952_v63  ;;  %v953_v2 = vpack.c.bf16 %v537_v0, %v535_v58  ;;  %v954_v3 = vpack.c.bf16 %v610_v1, %v608_v59 }
 0x158   : > { %740 = vst [vmem:[%s1475_s9 + $0x10] sm:$0xff] %v953_v2  ;;  %741 = vst [vmem:[%s1475_s9 + $0x18] sm:$0xff] %v954_v3  ;;  %v540_v4 = vpop.f32.mrb[4].mxu0  ;;  %v613_v5 = vpop.f32.mrb[4].mxu1 }
 0x159   : > { %v541_v6 = vadd.f32 %v540_v4, %v1458_v44  ;;  %v614_v7 = vadd.f32 %v613_v5, %v1460_v45  ;;  %v542_v8 = vpop.f32.mrb[5].mxu0  ;;  %v615_v9 = vpop.f32.mrb[5].mxu1 }
 0x15a   : > { %v543_v10 = vadd.f32 %v542_v8, %v1462_v46  ;;  %v616_v11 = vadd.f32 %v615_v9, %v1464_v47  ;;  %v544_v12 = vpop.f32.mrb[6].mxu0  ;;  %v617_v13 = vpop.f32.mrb[6].mxu1 }
 0x15b   : > { %v545_v14 = vadd.f32 %v544_v12, %v1458_v44  ;;  %v618_v15 = vadd.f32 %v617_v13, %v1460_v45  ;;  %v546_v16 = vpop.f32.mrb[7].mxu0  ;;  %v619_v17 = vpop.f32.mrb[7].mxu1 }
 0x15c   : > { %v955_v18 = vpack.c.bf16 %v543_v10, %v541_v6  ;;  %v956_v19 = vpack.c.bf16 %v616_v11, %v614_v7  ;;  %v547_v20 = vadd.f32 %v546_v16, %v1462_v46  ;;  %v620_v21 = vadd.f32 %v619_v17, %v1464_v47 }
 0x15e   : > { %742 = vst [vmem:[%s1475_s9 + $0x20] sm:$0xff] %v955_v18  ;;  %743 = vst [vmem:[%s1475_s9 + $0x28] sm:$0xff] %v956_v19  ;;  %v957_v22 = vpack.c.bf16 %v547_v20, %v545_v14  ;;  %v958_v23 = vpack.c.bf16 %v620_v21, %v618_v15 }
 0x160   : > { %744 = vst [vmem:[%s1475_s9 + $0x30] sm:$0xff] %v957_v22  ;;  %745 = vst [vmem:[%s1475_s9 + $0x38] sm:$0xff] %v958_v23  ;;  %v550_v24 = vpop.f32.mrb[8].mxu0  ;;  %v623_v25 = vpop.f32.mrb[8].mxu1 }
 0x161   : > { %v551_v26 = vadd.f32 %v550_v24, %v1458_v44  ;;  %v624_v27 = vadd.f32 %v623_v25, %v1460_v45  ;;  %v552_v28 = vpop.f32.mrb[9].mxu0  ;;  %v625_v29 = vpop.f32.mrb[9].mxu1 }
 0x162   : > { %v553_v30 = vadd.f32 %v552_v28, %v1462_v46  ;;  %v626_v31 = vadd.f32 %v625_v29, %v1464_v47  ;;  %v554_v32 = vpop.f32.mrb[10].mxu0  ;;  %v627_v33 = vpop.f32.mrb[10].mxu1 }
 0x163   : > { %v555_v34 = vadd.f32 %v554_v32, %v1458_v44  ;;  %v628_v35 = vadd.f32 %v627_v33, %v1460_v45  ;;  %v556_v36 = vpop.f32.mrb[11].mxu0  ;;  %v629_v37 = vpop.f32.mrb[11].mxu1 }
 0x164   : > { %v959_v38 = vpack.c.bf16 %v553_v30, %v551_v26  ;;  %v960_v39 = vpack.c.bf16 %v626_v31, %v624_v27  ;;  %v557_v40 = vadd.f32 %v556_v36, %v1462_v46  ;;  %v630_v41 = vadd.f32 %v629_v37, %v1464_v47 }
 0x166   : > { %746 = vst [vmem:[%s1475_s9 + $0x40] sm:$0xff] %v959_v38  ;;  %747 = vst [vmem:[%s1475_s9 + $0x48] sm:$0xff] %v960_v39  ;;  %v961_v42 = vpack.c.bf16 %v557_v40, %v555_v34  ;;  %v962_v43 = vpack.c.bf16 %v630_v41, %v628_v35 }
 0x168   : > { %748 = vst [vmem:[%s1475_s9 + $0x50] sm:$0xff] %v961_v42  ;;  %749 = vst [vmem:[%s1475_s9 + $0x58] sm:$0xff] %v962_v43  ;;  %v560_v48 = vpop.f32.mrb[12].mxu0  ;;  %v633_v49 = vpop.f32.mrb[12].mxu1 }
 0x169   : > { %v561_v50 = vadd.f32 %v560_v48, %v1458_v44  ;;  %v634_v51 = vadd.f32 %v633_v49, %v1460_v45  ;;  %v562_v52 = vpop.f32.mrb[13].mxu0  ;;  %v635_v53 = vpop.f32.mrb[13].mxu1 }
 0x16a   : > { %v563_v54 = vadd.f32 %v562_v52, %v1462_v46  ;;  %v636_v55 = vadd.f32 %v635_v53, %v1464_v47  ;;  %v564_v56 = vpop.f32.mrb[14].mxu0  ;;  %v637_v57 = vpop.f32.mrb[14].mxu1 }
 0x16b   : > { %v565_v58 = vadd.f32 %v564_v56, %v1458_v44  ;;  %v638_v59 = vadd.f32 %v637_v57, %v1460_v45  ;;  %v566_v60 = vpop.f32.mrb[15].mxu0  ;;  %v639_v61 = vpop.f32.mrb[15].mxu1 }
 0x16c   : > { %v963_v62 = vpack.c.bf16 %v563_v54, %v561_v50  ;;  %v964_v63 = vpack.c.bf16 %v636_v55, %v634_v51  ;;  %v567_v0 = vadd.f32 %v566_v60, %v1462_v46  ;;  %v640_v1 = vadd.f32 %v639_v61, %v1464_v47 }
 0x16e   : > { %750 = vst [vmem:[%s1475_s9 + $0x60] sm:$0xff] %v963_v62  ;;  %751 = vst [vmem:[%s1475_s9 + $0x68] sm:$0xff] %v964_v63  ;;  %v965_v44 = vpack.c.bf16 %v567_v0, %v565_v58  ;;  %v966_v45 = vpack.c.bf16 %v640_v1, %v638_v59 }
 0x170   : > { %752 = vst [vmem:[%s1475_s9 + $0x70] sm:$0xff] %v965_v44  ;;  %753 = vst [vmem:[%s1475_s9 + $0x78] sm:$0xff] %v966_v45 }
 0x171   : > { %1172 = shalt.err (!%p1169_p5)
}
 0x172   : > { %s1173_s29 = scalar_lea.hbm %s1518_s15, 2048  ;;  %s1177_s20 = scalar_lea.hbm %s1576_s3, 4096 }
 0x173   : > { %p1174_p9 = scmp.ne.s32.totalorder %s1518_s15, %s1173_s29  ;;  %p1178_p3 = scmp.lt.u32.totalorder %s1518_s15, %s1576_s3 }
 0x174   : > { %p1179_p7 = scmp.lt.u32.totalorder %s1177_s20, %s1173_s29  ;;  %p1181_p4 = scmp.lt.u32.totalorder %s1173_s29, %s1518_s15 }
 0x175   : > { %p1175_p1 = pnand %p1174_p9, %p1373_p10 }
 0x176   : > { %p1180_p13 = por %p1179_p7, %p1178_p3 }
 0x177   : > { %p1176_p2 = pneg %p1175_p1 }
 0x178   : > { %p1182_p6 = por %p1181_p4, %p1180_p13 }
 0x17a   : > { %p1183_p8 = pnand %p1182_p6, %p1176_p2 }
 0x17c   : > { %1186 = shalt.err (!%p1183_p8)
}
 0x17d   : > { %s1255_s9 = smov 256   ;;  %s1256_s10 = smov 16  }
 0x17e   : > { %975 = dma.vmem_to_hbm [thread:$0]  (%p1373_p10), %s1520_s11, 2048, %s1518_s15, %s755_s7, %s1255_s9, %s1255_s9, %s1256_s10  }
 0x17f PF: > { %s786_s18 = sand.u32 1, %s1225_s12   ;;  %p1594_p12 = scmp.ne.s32.totalorder %s1584_s23, 0 }
 0x180   : > { %p1595_p11 = scmp.ge.s32.totalorder %s1245_s17, 2  ;;  %s787_s26 = scalar_lea.sflag [#allocation4], %s786_s18 }
 0x182   : > { %p986_p0 = pnand %p1595_p11, %p1594_p12 }
 0x184   : > { %1220 = dma.done.wait (!%p986_p0), %s787_s26, 2048  }
 0x185   : > { %1222 = vsyncadd (!%p986_p0), %s787_s26, 4294965248  ;;  %s20_s17 = sadd.s32 1, %s1245_s17   ;;  %s1596_s12 = smov %s1229_s13 }
 0x186   : > { %p17_p5 = scmp.ge.s32.totalorder %s20_s17, 4   ;;  %s1597_s13 = smov %s1233_s14 }
 0x187   : > { %s1598_s14 = smov %s1382_s5  ;;  %s1599_s15 = smov %s1241_s16 }
 0x188   : > { %s1600_s16 = smov %s1602_s28  ;;  %19 = sbr.rel (!%p17_p5) target bundleno = 7 (0x7), region = 85 }
 0x18f   :  { %792 = vsyncpa [#allocation3], 1 }
 0x190   :  { %794 = vsyncpa [#allocation3 + $0x1], 1 }
 0x191   :  { %795 = vsyncpa [#allocation6], 1 }
 0x192   :  { %796 = vsyncpa [#allocation4], 1 }
 0x193   :  { %798 = vsyncpa [#allocation4 + $0x1], 1 }

</bundles_post_ra>
